<compile_context>
chip_gen: v5e
topology: v5e:2x2
jax: 0.10.0
libtpu: 0.0.40
codegen_flags: <defaults>
</compile_context>

<pallas_src>
import functools

import jax
import jax.numpy as jnp
from jax.experimental import pallas as pl
from jax.experimental.pallas import tpu as pltpu


def _round_up(x, m):
    return ((x + m - 1) // m) * m


# ---------------------------------------------------------------------------
# Pallas kernel: lane-packed deepsets neighborhood encoder
# ---------------------------------------------------------------------------
def _deepsets_kernel(obs_ref, w1_ref, b1_ref, w2_ref, b2_ref, p_ref, o_ref, *,
                     self_obs_dim, packed_dim):
    # Single contiguous neighbor slice + cast on the VMEM tile.
    x = obs_ref[:, self_obs_dim:self_obs_dim + packed_dim].astype(jnp.float32)  # (TB, N*D)

    # Layer 1: block-diagonal weights -> all N neighbors in one (TB, N*H) tanh.
    h1 = jnp.tanh(
        jnp.dot(x, w1_ref[...], preferred_element_type=jnp.float32) + b1_ref[...]
    )                                                                            # (TB, N*H)

    # Layer 2: same lane-packed structure.
    h2 = jnp.tanh(
        jnp.dot(h1, w2_ref[...], preferred_element_type=jnp.float32) + b2_ref[...]
    )                                                                            # (TB, N*H)

    # Mean pooling over neighbors as a matmul with P = kron(1_N / N, I_H).
    o_ref[...] = jnp.dot(
        h2, p_ref[...], preferred_element_type=jnp.float32
    ).astype(o_ref.dtype)                                                        # (TB, H)


# ---------------------------------------------------------------------------
# Wrapper mirroring QuadNeighborhoodEncoderDeepsets.forward
# ---------------------------------------------------------------------------
def quad_deepsets_encoder(self_obs, obs, params, *,
                          self_obs_dim, neighbor_obs_dim,
                          neighbor_hidden_size, num_use_neighbor_obs,
                          tile_batch=4096):
    del self_obs  # unused by this encoder variant (matches the PyTorch code)
    w1, b1, w2, b2 = params

    B, obs_dim = obs.shape
    N, D, H = num_use_neighbor_obs, neighbor_obs_dim, neighbor_hidden_size
    packed_dim = N * D
    packed_hid = N * H
    assert obs_dim >= self_obs_dim + packed_dim

    # --- lane-packed parameters (tiny: a few hundred KB at most) -----------
    f32 = jnp.float32
    eye_n = jnp.eye(N, dtype=f32)
    w1_bd = jnp.kron(eye_n, w1.astype(f32))                        # (N*D, N*H)
    w2_bd = jnp.kron(eye_n, w2.astype(f32))                        # (N*H, N*H)
    b1_t = jnp.tile(b1.astype(f32).reshape(1, H), (1, N))          # (1, N*H)
    b2_t = jnp.tile(b2.astype(f32).reshape(1, H), (1, N))          # (1, N*H)
    pool = jnp.kron(jnp.full((N, 1), 1.0 / N, dtype=f32),
                    jnp.eye(H, dtype=f32))                         # (N*H, H)

    # --- batch tile selection (no padding; Pallas masks the boundary block) -
    tile_batch = max(128, (tile_batch // 128) * 128)   # multiple of 8 and 128
    if B <= 256:
        TB = B                                   # single tile, block == full dims
    elif B <= tile_batch:
        # Split into >=2 tiles so both v7x TensorCores get work (harmless on
        # single-TC v5e/v6e: one extra ~0.35us grid step).
        TB = min(_round_up(-(-B // 2), 128), tile_batch)
    else:
        TB = tile_batch
    num_tiles = -(-B // TB)

    kernel = functools.partial(
        _deepsets_kernel,
        self_obs_dim=self_obs_dim,
        packed_dim=packed_dim,
    )

    out = pl.pallas_call(
        kernel,
        out_shape=jax.ShapeDtypeStruct((B, H), jnp.float32),
        grid_spec=pltpu.PrefetchScalarGridSpec(
            num_scalar_prefetch=0,
            grid=(num_tiles,),
            in_specs=[
                pl.BlockSpec((TB, obs_dim), lambda b: (b, 0)),        # obs tile
                pl.BlockSpec((packed_dim, packed_hid), lambda b: (0, 0)),  # W1_bd
                pl.BlockSpec((1, packed_hid), lambda b: (0, 0)),           # b1_t
                pl.BlockSpec((packed_hid, packed_hid), lambda b: (0, 0)),  # W2_bd
                pl.BlockSpec((1, packed_hid), lambda b: (0, 0)),           # b2_t
                pl.BlockSpec((packed_hid, H), lambda b: (0, 0)),           # pool
            ],
            out_specs=pl.BlockSpec((TB, H), lambda b: (b, 0)),
        ),
        compiler_params=pltpu.CompilerParams(
            dimension_semantics=("parallel",),
        ),
    )(obs, w1_bd, b1_t, w2_bd, b2_t, pool)

    return out


# ---------------------------------------------------------------------------
# Deterministic parameter init (PyTorch nn.Linear-style uniform(-k, k))
# ---------------------------------------------------------------------------
def init_params(key, neighbor_obs_dim, neighbor_hidden_size):
    D, H = neighbor_obs_dim, neighbor_hidden_size
    k1, k2, k3, k4 = jax.random.split(key, 4)
    lim1 = 1.0 / jnp.sqrt(D)
    lim2 = 1.0 / jnp.sqrt(H)
    w1 = jax.random.uniform(k1, (D, H), jnp.float32, -lim1, lim1)
    b1 = jax.random.uniform(k2, (1, H), jnp.float32, -lim1, lim1)
    w2 = jax.random.uniform(k3, (H, H), jnp.float32, -lim2, lim2)
    b2 = jax.random.uniform(k4, (1, H), jnp.float32, -lim2, lim2)
    return w1, b1, w2, b2


# Pure-JAX reference for sanity checking
def reference(obs, params, self_obs_dim, neighbor_obs_dim,
              neighbor_hidden_size, num_use_neighbor_obs):
    w1, b1, w2, b2 = params
    batch_size = obs.shape[0]
    all_neighbor_obs_size = neighbor_obs_dim * num_use_neighbor_obs
    x = obs[:, self_obs_dim:self_obs_dim + all_neighbor_obs_size]
    x = x.reshape(-1, neighbor_obs_dim)
    h = jnp.tanh(x @ w1 + b1)
    h = jnp.tanh(h @ w2 + b2)
    h = h.reshape(batch_size, -1, neighbor_hidden_size)
    return jnp.mean(h, axis=1)


if __name__ == "__main__":
    # Representative (small) shapes for the quad swarm model.
    self_obs_dim = 18
    neighbor_obs_dim = 6
    num_use_neighbor_obs = 6
    neighbor_hidden_size = 32

    all_neighbor_obs_size = neighbor_obs_dim * num_use_neighbor_obs
    obs_dim = self_obs_dim + all_neighbor_obs_size          # 18 + 36 = 54

    key = jax.random.PRNGKey(0)
    k_obs, k_obs2, k_param = jax.random.split(key, 3)
    params = init_params(k_param, neighbor_obs_dim, neighbor_hidden_size)

    # --- case 1: small batch, single tile (block == full array dims) -------
    batch_size = 8
    obs = jax.random.normal(k_obs, (batch_size, obs_dim), jnp.float32)
    self_obs = obs[:, :self_obs_dim]

    out = quad_deepsets_encoder(
        self_obs, obs, params,
        self_obs_dim=self_obs_dim,
        neighbor_obs_dim=neighbor_obs_dim,
        neighbor_hidden_size=neighbor_hidden_size,
        num_use_neighbor_obs=num_use_neighbor_obs,
    )
    out = jax.block_until_ready(out)
    ref = reference(obs, params, self_obs_dim, neighbor_obs_dim,
                    neighbor_hidden_size, num_use_neighbor_obs)
    assert out.shape == (batch_size, neighbor_hidden_size)
    assert jnp.allclose(out, ref, atol=1e-5, rtol=1e-5)

    # --- case 2: multi-tile path with a masked (non-divisible) boundary ----
    batch_size2 = 300
    obs2 = jax.random.normal(k_obs2, (batch_size2, obs_dim), jnp.float32)
    out2 = quad_deepsets_encoder(
        obs2[:, :self_obs_dim], obs2, params,
        self_obs_dim=self_obs_dim,
        neighbor_obs_dim=neighbor_obs_dim,
        neighbor_hidden_size=neighbor_hidden_size,
        num_use_neighbor_obs=num_use_neighbor_obs,
    )
    out2 = jax.block_until_ready(out2)
    ref2 = reference(obs2, params, self_obs_dim, neighbor_obs_dim,
                     neighbor_hidden_size, num_use_neighbor_obs)
    assert out2.shape == (batch_size2, neighbor_hidden_size)
    assert jnp.allclose(out2, ref2, atol=1e-5, rtol=1e-5)

    print("KERNEL_OK")
</pallas_src>

<mosaic_0001>
module attributes {stable_mosaic.version = 11 : i64} {
  func.func @_deepsets_kernel(%arg0: i32, %arg1: memref<8x54xf32, #tpu.memory_space<vmem>>, %arg2: memref<36x192xf32, #tpu.memory_space<vmem>>, %arg3: memref<1x192xf32, #tpu.memory_space<vmem>>, %arg4: memref<192x192xf32, #tpu.memory_space<vmem>>, %arg5: memref<1x192xf32, #tpu.memory_space<vmem>>, %arg6: memref<192x32xf32, #tpu.memory_space<vmem>>, %arg7: memref<8x32xf32, #tpu.memory_space<vmem>>) attributes {dimension_semantics = [#tpu.dimension_semantics<parallel>], iteration_bounds = array<i64: 1>, scalar_prefetch = 0 : i64, scratch_operands = 0 : i64, tpu.core_type = #tpu.core_type<tc>, window_params = [{transform_indices = @transform_0, window_bounds = array<i64: 8, 54>}, {pipeline_mode = #tpu.pipeline_mode<synchronous>, transform_indices = @transform_1, window_bounds = array<i64: 36, 192>}, {pipeline_mode = #tpu.pipeline_mode<synchronous>, transform_indices = @transform_2, window_bounds = array<i64: 1, 192>}, {pipeline_mode = #tpu.pipeline_mode<synchronous>, transform_indices = @transform_3, window_bounds = array<i64: 192, 192>}, {pipeline_mode = #tpu.pipeline_mode<synchronous>, transform_indices = @transform_4, window_bounds = array<i64: 1, 192>}, {pipeline_mode = #tpu.pipeline_mode<synchronous>, transform_indices = @transform_5, window_bounds = array<i64: 192, 32>}, {transform_indices = @transform_6, window_bounds = array<i64: 8, 32>}]} {
    %c0 = arith.constant 0 : index
    %c18 = arith.constant 18 : index
    %0 = vector.load %arg1[%c0, %c18] : memref<8x54xf32, #tpu.memory_space<vmem>>, vector<8x36xf32>
    %c0_0 = arith.constant 0 : index
    %c0_1 = arith.constant 0 : index
    %1 = vector.load %arg2[%c0_0, %c0_1] : memref<36x192xf32, #tpu.memory_space<vmem>>, vector<36x192xf32>
    %cst = arith.constant dense<0.000000e+00> : vector<8x192xf32>
    %2 = tpu.matmul %0, %1, %cst {dimension_numbers = #tpu.dot_dimension_numbers<[1], [0], [0], [1], [0, 0, 1, 1], [], []>} : vector<8x36xf32>, vector<36x192xf32>, vector<8x192xf32> -> vector<8x192xf32>
    %c0_2 = arith.constant 0 : index
    %c0_3 = arith.constant 0 : index
    %3 = vector.load %arg3[%c0_2, %c0_3] : memref<1x192xf32, #tpu.memory_space<vmem>>, vector<1x192xf32>
    %4 = vector.broadcast %3 : vector<1x192xf32> to vector<8x192xf32>
    %5 = arith.addf %2, %4 : vector<8x192xf32>
    %6 = math.tanh %5 : vector<8x192xf32>
    %c0_4 = arith.constant 0 : index
    %c0_5 = arith.constant 0 : index
    %7 = vector.load %arg4[%c0_4, %c0_5] : memref<192x192xf32, #tpu.memory_space<vmem>>, vector<192x192xf32>
    %cst_6 = arith.constant dense<0.000000e+00> : vector<8x192xf32>
    %8 = tpu.matmul %6, %7, %cst_6 {dimension_numbers = #tpu.dot_dimension_numbers<[1], [0], [0], [1], [0, 0, 1, 1], [], []>} : vector<8x192xf32>, vector<192x192xf32>, vector<8x192xf32> -> vector<8x192xf32>
    %c0_7 = arith.constant 0 : index
    %c0_8 = arith.constant 0 : index
    %9 = vector.load %arg5[%c0_7, %c0_8] : memref<1x192xf32, #tpu.memory_space<vmem>>, vector<1x192xf32>
    %10 = vector.broadcast %9 : vector<1x192xf32> to vector<8x192xf32>
    %11 = arith.addf %8, %10 : vector<8x192xf32>
    %12 = math.tanh %11 : vector<8x192xf32>
    %c0_9 = arith.constant 0 : index
    %c0_10 = arith.constant 0 : index
    %13 = vector.load %arg6[%c0_9, %c0_10] : memref<192x32xf32, #tpu.memory_space<vmem>>, vector<192x32xf32>
    %cst_11 = arith.constant dense<0.000000e+00> : vector<8x32xf32>
    %14 = tpu.matmul %12, %13, %cst_11 {dimension_numbers = #tpu.dot_dimension_numbers<[1], [0], [0], [1], [0, 0, 1, 1], [], []>} : vector<8x192xf32>, vector<192x32xf32>, vector<8x32xf32> -> vector<8x32xf32>
    %c0_12 = arith.constant 0 : index
    %c0_13 = arith.constant 0 : index
    %15 = vector.load %arg7[%c0_12, %c0_13] : memref<8x32xf32, #tpu.memory_space<vmem>>, vector<8x32xf32>
    tpu.vector_store %arg7[%c0_12, %c0_13], %14 {strides = array<i32>} : memref<8x32xf32, #tpu.memory_space<vmem>>, vector<8x32xf32>,
    return
  }
  func.func @transform_0(%arg0: i32) -> (i32, i32) {
    %c0_i32 = arith.constant 0 : i32
    %c0_i32_0 = arith.constant 0 : i32
    return %arg0, %c0_i32 : i32, i32
  }
  func.func @transform_1(%arg0: i32) -> (i32, i32) {
    %c0_i32 = arith.constant 0 : i32
    %c0_i32_0 = arith.constant 0 : i32
    %c0_i32_1 = arith.constant 0 : i32
    return %c0_i32, %c0_i32_0 : i32, i32
  }
  func.func @transform_2(%arg0: i32) -> (i32, i32) {
    %c0_i32 = arith.constant 0 : i32
    %c0_i32_0 = arith.constant 0 : i32
    %c0_i32_1 = arith.constant 0 : i32
    return %c0_i32, %c0_i32_0 : i32, i32
  }
  func.func @transform_3(%arg0: i32) -> (i32, i32) {
    %c0_i32 = arith.constant 0 : i32
    %c0_i32_0 = arith.constant 0 : i32
    %c0_i32_1 = arith.constant 0 : i32
    return %c0_i32, %c0_i32_0 : i32, i32
  }
  func.func @transform_4(%arg0: i32) -> (i32, i32) {
    %c0_i32 = arith.constant 0 : i32
    %c0_i32_0 = arith.constant 0 : i32
    %c0_i32_1 = arith.constant 0 : i32
    return %c0_i32, %c0_i32_0 : i32, i32
  }
  func.func @transform_5(%arg0: i32) -> (i32, i32) {
    %c0_i32 = arith.constant 0 : i32
    %c0_i32_0 = arith.constant 0 : i32
    %c0_i32_1 = arith.constant 0 : i32
    return %c0_i32, %c0_i32_0 : i32, i32
  }
  func.func @transform_6(%arg0: i32) -> (i32, i32) {
    %c0_i32 = arith.constant 0 : i32
    %c0_i32_0 = arith.constant 0 : i32
    return %arg0, %c0_i32 : i32, i32
  }
}

</mosaic_0001>

<bundles_post_ra>
// kernel: tpu_custom_call.1
= control target key start
LH: loop header
LB: loop body
LE: loop exit
PB: predicated region body
PF: predicated region fallthrough
CT: control target
= control target key end

     0   :  { %11 = vsyncpa [#allocation3], 0  ;;  %s570_s0 = inlined_call_operand.vmem [shape: f32[8,54], index: 0, kind: input, shape index: {}]   ;;  %s571_s1 = inlined_call_operand.vmem [shape: f32[36,192], index: 1, kind: input, shape index: {}]   ;;  %s572_s2 = inlined_call_operand.vmem [shape: f32[1,192], index: 2, kind: input, shape index: {}]   ;;  %s573_s3 = inlined_call_operand.hbm [shape: f32[192,192], index: 3, kind: input, shape index: {}]   ;;  %s574_s4 = inlined_call_operand.vmem [shape: f32[1,192], index: 4, kind: input, shape index: {}]   ;;  %s575_s5 = inlined_call_operand.vmem [shape: f32[192,32], index: 5, kind: input, shape index: {}]   ;;  %s576_s6 = inlined_call_operand.hbm [shape: f32[8,32], index: 6, kind: output, shape index: {}]  }
   0x1   :  { %12 = vsyncpa [#allocation4], 0  ;;  %s23_s23 = sshll.u32 %s573_s3, 4  ;;  %s410_s24 = smov [#allocation2]   ;;  %s24_s23 = int_to_ptr.hbm [resolvable:$true] %s23_s23 }
   0x2   :  { %s25_s25 = sshll.u32 %s410_s24, 4  ;;  %s411_s26 = smov 256   ;;  %s26_s25 = int_to_ptr.vmem [resolvable:$true] %s25_s25 }
   0x3   :  { %s412_s27 = smov 16  }
   0x4   :  { %31 = dma.hbm_to_vmem [thread:$0]  %s24_s23, 6144, %s26_s25, [#allocation3], %s411_s26, %s411_s26, %s412_s27  }
   0x5   :  { %406 = dma.done.wait [#allocation3], 6144  }
   0x6   :  { %407 = vsyncadd [#allocation3], 4294961152  ;;  %vm63_vm0 = vcmask 1043456   ;;  %v40_v0 = vld [vmem:[%s570_s0] sm:$0xff]  ;;  %v50_v2 = vld [vmem:[%s571_s1 + $0x48] sm:$0xf] }
   0x7   :  { %v49_v1 = vld [vmem:[%s571_s1 + $0x40] sm:$0xf]  ;;  %s413_s9 = smov 110   ;;  %v47_v3 = vld [vmem:[%s571_s1 + $0x30] sm:$0xff]  ;;  %v48_v4 = vld [vmem:[%s571_s1 + $0x38] sm:$0xff]  ;;  %340 = vmatpush.msk.msra.mxu1 %vm63_vm0, %v50_v2  ;;  %vm60_vm1 = vcmask 293888  }
   0x8   :  { %58 = vrot.lane.b32.xlu0 %v40_v0, %s413_s9  ;;  %338 = vmatpush.msk.msra.mxu0 %vm63_vm0, %v49_v1  ;;  %v45_v5 = vld [vmem:[%s571_s1 + $0x20] sm:$0xff]  ;;  %v46_v6 = vld [vmem:[%s571_s1 + $0x28] sm:$0xff]  ;;  %v43_v7 = vld [vmem:[%s571_s1 + $0x10] sm:$0xff]  ;;  %vm166_vm2 = vcmask 523264   ;;  %s328_s23 = sshll.u32 %s576_s6, 4  ;;  %vm319_vm3 = vcmask 261120   ;;  %s329_s23 = int_to_ptr.hbm [resolvable:$true] %s328_s23 }
   0x9   :  { %102 = vmatpush.msra.mxu1 %v48_v4  ;;  %v44_v8 = vld [vmem:[%s571_s1 + $0x18] sm:$0xff]  ;;  %v41_v9 = vld [vmem:[%s571_s1] sm:$0xff]  ;;  %v42_v10 = vld [vmem:[%s571_s1 + $0x8] sm:$0xff] }
   0xa   :  { %82 = vmatpush.msra.mxu0 %v47_v3  ;;  %v142_v11 = vld [vmem:[#allocation2 + $0xf0] sm:$0xff]  ;;  %v143_v12 = vld [vmem:[#allocation2 + $0xf8] sm:$0xff]  ;;  %v140_v13 = vld [vmem:[#allocation2 + $0xe0] sm:$0xff] }
   0xb   :  { %103 = vmatpush.msra.mxu1 %v46_v6  ;;  %170 = vmatpush.msra.mxu2 %v142_v11  ;;  %v141_v14 = vld [vmem:[#allocation2 + $0xe8] sm:$0xff]  ;;  %v138_v15 = vld [vmem:[#allocation2 + $0xd0] sm:$0xff]  ;;  %v139_v16 = vld [vmem:[#allocation2 + $0xd8] sm:$0xff] }
   0xc   :  { %83 = vmatpush.msra.mxu0 %v45_v5  ;;  %v136_v17 = vld [vmem:[#allocation2 + $0xc0] sm:$0xff]  ;;  %v137_v18 = vld [vmem:[#allocation2 + $0xc8] sm:$0xff]  ;;  %v158_v19 = vld [vmem:[#allocation2 + $0x170] sm:$0xff] }
   0xd   :  { %104 = vmatpush.msra.mxu1 %v44_v8  ;;  %171 = vmatpush.msra.mxu2 %v140_v13  ;;  %v134_v20 = vld [vmem:[#allocation2 + $0xb0] sm:$0xff]  ;;  %v135_v21 = vld [vmem:[#allocation2 + $0xb8] sm:$0xff]  ;;  %v156_v23 = vld [vmem:[#allocation2 + $0x160] sm:$0xff] }
   0xe   :  { %84 = vmatpush.msra.mxu0 %v43_v7  ;;  %198 = vmatpush.msra.mxu3 %v158_v19  ;;  %v159_v22 = vld [vmem:[#allocation2 + $0x178] sm:$0xff]  ;;  %v157_v24 = vld [vmem:[#allocation2 + $0x168] sm:$0xff]  ;;  %v132_v25 = vld [vmem:[#allocation2 + $0xa0] sm:$0xff] }
   0xf   :  { %105 = vmatpush.msra.mxu1 %v42_v10  ;;  %172 = vmatpush.msra.mxu2 %v138_v15  ;;  %v133_v26 = vld [vmem:[#allocation2 + $0xa8] sm:$0xff]  ;;  %v154_v27 = vld [vmem:[#allocation2 + $0x150] sm:$0xff]  ;;  %v155_v28 = vld [vmem:[#allocation2 + $0x158] sm:$0xff] }
  0x10   :  { %85 = vmatpush.msra.mxu0 %v41_v9  ;;  %199 = vmatpush.msra.mxu3 %v156_v23  ;;  %v130_v29 = vld [vmem:[#allocation2 + $0x90] sm:$0xff]  ;;  %v131_v30 = vld [vmem:[#allocation2 + $0x98] sm:$0xff]  ;;  %v128_v31 = vld [vmem:[#allocation2 + $0x80] sm:$0xff] }
  0x11   :  { %173 = vmatpush.msra.mxu2 %v136_v17  ;;  %238 = vmatpush.msrb.mxu1 %v159_v22  ;;  %v129_v32 = vld [vmem:[#allocation2 + $0x88] sm:$0xff]  ;;  %v126_v33 = vld [vmem:[#allocation2 + $0x70] sm:$0xff]  ;;  %v127_v34 = vld [vmem:[#allocation2 + $0x78] sm:$0xff] }
  0x12   :  { %210 = vmatpush.msrb.mxu0 %v143_v12  ;;  %200 = vmatpush.msra.mxu3 %v154_v27  ;;  %v124_v35 = vld [vmem:[#allocation2 + $0x60] sm:$0xff]  ;;  %v125_v36 = vld [vmem:[#allocation2 + $0x68] sm:$0xff]  ;;  %v122_v37 = vld [vmem:[#allocation2 + $0x50] sm:$0xff] }
  0x13   :  { %174 = vmatpush.msra.mxu2 %v134_v20  ;;  %239 = vmatpush.msrb.mxu1 %v157_v24  ;;  %v123_v38 = vld [vmem:[#allocation2 + $0x58] sm:$0xff]  ;;  %v120_v40 = vld [vmem:[#allocation2 + $0x40] sm:$0xff]  ;;  %v121_v42 = vld [vmem:[#allocation2 + $0x48] sm:$0xff] }
  0x14   :  { %211 = vmatpush.msrb.mxu0 %v141_v14  ;;  %v152_v41 = vld [vmem:[#allocation2 + $0x140] sm:$0xff]  ;;  %v153_v43 = vld [vmem:[#allocation2 + $0x148] sm:$0xff]  ;;  %v118_v44 = vld [vmem:[#allocation2 + $0x30] sm:$0xff] }
  0x15   :  { %175 = vmatpush.msra.mxu2 %v132_v25  ;;  %240 = vmatpush.msrb.mxu1 %v155_v28  ;;  %v150_v45 = vld [vmem:[#allocation2 + $0x130] sm:$0xff]  ;;  %v119_v46 = vld [vmem:[#allocation2 + $0x38] sm:$0xff]  ;;  %v116_v48 = vld [vmem:[#allocation2 + $0x20] sm:$0xff] }
  0x16   :  { %212 = vmatpush.msrb.mxu0 %v139_v16  ;;  %201 = vmatpush.msra.mxu3 %v152_v41  ;;  %v151_v47 = vld [vmem:[#allocation2 + $0x138] sm:$0xff]  ;;  %v148_v49 = vld [vmem:[#allocation2 + $0x120] sm:$0xff]  ;;  %v117_v50 = vld [vmem:[#allocation2 + $0x28] sm:$0xff] }
  0x17   :  { %176 = vmatpush.msra.mxu2 %v130_v29  ;;  %241 = vmatpush.msrb.mxu1 %v153_v43  ;;  %v149_v51 = vld [vmem:[#allocation2 + $0x128] sm:$0xff]  ;;  %v114_v52 = vld [vmem:[#allocation2 + $0x10] sm:$0xff]  ;;  %v115_v54 = vld [vmem:[#allocation2 + $0x18] sm:$0xff] }
  0x18   :  { %213 = vmatpush.msrb.mxu0 %v137_v18  ;;  %202 = vmatpush.msra.mxu3 %v150_v45  ;;  %v146_v53 = vld [vmem:[#allocation2 + $0x110] sm:$0xff]  ;;  %v147_v55 = vld [vmem:[#allocation2 + $0x118] sm:$0xff]  ;;  %v112_v56 = vld [vmem:[#allocation2] sm:$0xff] }
  0x19   :  { %177 = vmatpush.msra.mxu2 %v128_v31  ;;  %242 = vmatpush.msrb.mxu1 %v151_v47  ;;  %v144_v57 = vld [vmem:[#allocation2 + $0x100] sm:$0xff]  ;;  %v113_v58 = vld [vmem:[#allocation2 + $0x8] sm:$0xff]  ;;  %v267_v60 = vld [vmem:[%s575_s5 + $0x78] sm:$0xff] }
  0x1a   :  { %214 = vmatpush.msrb.mxu0 %v135_v21  ;;  %203 = vmatpush.msra.mxu3 %v148_v49  ;;  %v145_v59 = vld [vmem:[#allocation2 + $0x108] sm:$0xff]  ;;  %v266_v61 = vld [vmem:[%s575_s5 + $0x70] sm:$0xff]  ;;  %v275_v63 = vld [vmem:[%s575_s5 + $0xb8] sm:$0xff] }
  0x1b   :  { %178 = vmatpush.msra.mxu2 %v126_v33  ;;  %243 = vmatpush.msrb.mxu1 %v149_v51  ;;  %v265_v62 = vld [vmem:[%s575_s5 + $0x68] sm:$0xff]  ;;  %v274_v0 = vld [vmem:[%s575_s5 + $0xb0] sm:$0xff]  ;;  %v264_v1 = vld [vmem:[%s575_s5 + $0x60] sm:$0xff] }
  0x1c   :  { %215 = vmatpush.msrb.mxu0 %v133_v26  ;;  %204 = vmatpush.msra.mxu3 %v146_v53  ;;  %v263_v2 = vld [vmem:[%s575_s5 + $0x58] sm:$0xff]  ;;  %v262_v3 = vld [vmem:[%s575_s5 + $0x50] sm:$0xff]  ;;  %v261_v4 = vld [vmem:[%s575_s5 + $0x48] sm:$0xff] }
  0x1d   :  { %179 = vmatpush.msra.mxu2 %v124_v35  ;;  %244 = vmatpush.msrb.mxu1 %v147_v55  ;;  %v51_v5 = vld [vmem:[%s572_s2] sm:$0x3]  ;;  %v273_v15 = vld [vmem:[%s575_s5 + $0xa8] sm:$0xff]  ;;  %v259_v16 = vld [vmem:[%s575_s5 + $0x38] sm:$0xff] }
  0x1e   :  { %216 = vmatpush.msrb.mxu0 %v131_v30  ;;  %205 = vmatpush.msra.mxu3 %v144_v57  ;;  %v53_v6 = vperm.slane %v51_v5, 0  ;;  %v54_v7 = vperm.slane %v51_v5, 1  ;;  %v260_v14 = vld [vmem:[%s575_s5 + $0x40] sm:$0xff]  ;;  %v258_v18 = vld [vmem:[%s575_s5 + $0x30] sm:$0xff]  ;;  %v271_v19 = vld [vmem:[%s575_s5 + $0x98] sm:$0xff] }
  0x1f   :  { %180 = vmatpush.msra.mxu2 %v122_v37  ;;  %245 = vmatpush.msrb.mxu1 %v145_v59  ;;  %v272_v17 = vld [vmem:[%s575_s5 + $0xa0] sm:$0xff]  ;;  %v257_v20 = vld [vmem:[%s575_s5 + $0x28] sm:$0xff]  ;;  %v270_v21 = vld [vmem:[%s575_s5 + $0x90] sm:$0xff] }
  0x20   :  { %217 = vmatpush.msrb.mxu0 %v129_v32  ;;  %279 = vmatpush.msrb.mxu3 %v267_v60  ;;  %v256_v22 = vld [vmem:[%s575_s5 + $0x20] sm:$0xff]  ;;  %v269_v23 = vld [vmem:[%s575_s5 + $0x88] sm:$0xff]  ;;  %v255_v24 = vld [vmem:[%s575_s5 + $0x18] sm:$0xff] }
  0x21   :  { %181 = vmatpush.msra.mxu2 %v120_v40  ;;  %v268_v25 = vld [vmem:[%s575_s5 + $0x80] sm:$0xff]  ;;  %v254_v26 = vld [vmem:[%s575_s5 + $0x10] sm:$0xff]  ;;  %v253_v27 = vld [vmem:[%s575_s5 + $0x8] sm:$0xff] }
  0x22   :  { %218 = vmatpush.msrb.mxu0 %v127_v34  ;;  %280 = vmatpush.msrb.mxu3 %v266_v61  ;;  %v252_v28 = vld [vmem:[%s575_s5] sm:$0xff]  ;;  %s414_s5 = smov [#allocation5]  }
  0x23   :  { %182 = vmatpush.msra.mxu2 %v118_v44  ;;  %v160_v29 = vld [vmem:[%s574_s4] sm:$0x3]  ;;  %s326_s21 = sshll.u32 %s414_s5, 4  ;;  %s327_s21 = int_to_ptr.vmem [resolvable:$true] %s326_s21 }
  0x24   :  { %219 = vmatpush.msrb.mxu0 %v125_v36  ;;  %281 = vmatpush.msrb.mxu3 %v265_v62  ;;  %v163_v30 = vperm.slane %v160_v29, 1  ;;  %v162_v35 = vperm.slane %v160_v29, 0 }
  0x25   :  { %183 = vmatpush.msra.mxu2 %v116_v48 }
  0x26   :  { %220 = vmatpush.msrb.mxu0 %v123_v38  ;;  %282 = vmatpush.msrb.mxu3 %v264_v1 }
  0x27   :  { %184 = vmatpush.msra.mxu2 %v114_v52 }
  0x28   :  { %221 = vmatpush.msrb.mxu0 %v121_v42  ;;  %283 = vmatpush.msrb.mxu3 %v263_v2 }
  0x29   :  { %185 = vmatpush.msra.mxu2 %v112_v56 }
  0x2a   :  { %222 = vmatpush.msrb.mxu0 %v119_v46  ;;  %284 = vmatpush.msrb.mxu3 %v262_v3 }
  0x2c   :  { %223 = vmatpush.msrb.mxu0 %v117_v50  ;;  %285 = vmatpush.msrb.mxu3 %v261_v4 }
  0x2e   :  { %224 = vmatpush.msrb.mxu0 %v115_v54  ;;  %286 = vmatpush.msrb.mxu3 %v260_v14 }
  0x30   :  { %225 = vmatpush.msrb.mxu0 %v113_v58  ;;  %287 = vmatpush.msrb.mxu3 %v259_v16 }
  0x32   :  { %288 = vmatpush.msrb.mxu3 %v258_v18 }
  0x34   :  { %289 = vmatpush.msrb.mxu3 %v257_v20 }
  0x36   :  { %290 = vmatpush.msrb.mxu3 %v256_v22 }
  0x38   :  { %291 = vmatpush.msrb.mxu3 %v255_v24 }
  0x3a   :  { %292 = vmatpush.msrb.mxu3 %v254_v26 }
  0x3c   :  { %293 = vmatpush.msrb.mxu3 %v253_v27 }
  0x3e   :  { %294 = vmatpush.msrb.mxu3 %v252_v28 }
  0x7a   :  { %v59_v39 = vpop.permute.xlu0 %58 }
  0x7b   :  { %339 = vmatmul.msk.f32.vlgmr.msra.gmra.mxu0 %vm60_vm1, %v59_v39  ;;  %341 = vmatmul.msk.f32.vlgmr.msra.gmra.mxu1 %vm60_vm1, %v59_v39 }
  0x7c   :  { %307 = vmatpush.msra.mxu1 %v275_v63 }
  0x7e   :  { %308 = vmatpush.msra.mxu1 %v274_v0 }
  0x80   :  { %309 = vmatpush.msra.mxu1 %v273_v15 }
  0x82   :  { %310 = vmatpush.msra.mxu1 %v272_v17 }
  0x84   :  { %311 = vmatpush.msra.mxu1 %v271_v19 }
  0x86   :  { %312 = vmatpush.msra.mxu1 %v270_v21 }
  0x88   :  { %313 = vmatpush.msra.mxu1 %v269_v23 }
  0x8a   :  { %314 = vmatpush.msra.mxu1 %v268_v25 }
  0xf8   :  { %v87_v8 = vpop.f32.mrf.mxu0  ;;  %v107_v9 = vpop.f32.mrf.mxu1 }
  0xf9   :  { %v88_v10 = vadd.f32 %v87_v8, %v53_v6  ;;  %v108_v11 = vadd.f32 %v107_v9, %v54_v7 }
  0xfb   :  { %350 = vtanh.f32 %v88_v10 }
  0xfc   :  { %352 = vtanh.f32 %v108_v11 }
 0x101   :  { %v351_v12 = vpop.eup %350 }
 0x102   :  { %v353_v13 = vpop.eup %352  ;;  %186 = vmatmul.f32.vlgmr.msra.gmra.mxu2 %v351_v12  ;;  %226 = vmatmul.f32.vlgmr.msrb.gmra.mxu0 %v351_v12 }
 0x103   :  { %342 = vmatmul.msk.f32.vlgmr.msra.gmra.mxu3 %vm166_vm2, %v353_v13  ;;  %343 = vmatmul.msk.f32.vlgmr.msrb.gmra.mxu1 %vm166_vm2, %v353_v13 }
 0x17f   :  { %v227_v31 = vpop.f32.mrf.mxu0 }
 0x180   :  { %v228_v32 = vadd.f32 %v227_v31, %v163_v30  ;;  %v247_v33 = vpop.f32.mrf.mxu1 }
 0x182   :  { %v248_v34 = vadd.f32 %v247_v33, %v228_v32 }
 0x184   :  { %354 = vtanh.f32 %v248_v34 }
 0x185   :  { %v187_v36 = vpop.f32.mrf.mxu2 }
 0x186   :  { %v188_v37 = vadd.f32 %v187_v36, %v162_v35  ;;  %v207_v38 = vpop.f32.mrf.mxu3 }
 0x188   :  { %v208_v39 = vadd.f32 %v207_v38, %v188_v37 }
 0x18a   :  { %v355_v40 = vpop.eup %354  ;;  %356 = vtanh.f32 %v208_v39 }
 0x18b   :  { %344 = vmatmul.msk.f32.vlgmr.msra.gmra.mxu1 %vm166_vm2, %v355_v40 }
 0x190   :  { %v357_v41 = vpop.eup %356 }
 0x191   :  { %295 = vmatmul.f32.vlgmr.msrb.gmra.mxu3 %v357_v41 }
 0x208   :  { %v316_v42 = vpop.f32.mrf.mxu1 }
 0x214   :  { %v296_v43 = vpop.f32.mrf.mxu3 }
 0x215   :  { %v317_v44 = vadd.f32 %v316_v42, %v296_v43 }
 0x217   :  { %320 = vst.msk [vmem:[#allocation5] sm:$0xff] %vm319_vm3, %v317_v44 }
 0x218   :  { %331 = dma.vmem_to_hbm [thread:$0]  %s327_s21, 128, %s329_s23, [#allocation4]  }
 0x219   :  { %408 = dma.done.wait [#allocation4], 128  }
 0x21a   :  { %409 = vsyncadd [#allocation4], 4294967168 }
 0x21b   :  { %336 = vsyncpa [#allocation3], 1 }
 0x21c   :  { %337 = vsyncpa [#allocation4], 1 }

</bundles_post_ra>
